<compile_context>
chip_gen: v5e
topology: v5e:2x2
jax: 0.10.0
libtpu: 0.0.40
codegen_flags: <defaults>
</compile_context>

<pallas_src>
import functools

import jax
import jax.numpy as jnp
import numpy as np
from jax.experimental import pallas as pl
from jax.experimental.pallas import tpu as pltpu

KERNEL_SIZE = 5
SIGMA = 4.0
C_FEAT = 512  # channel count feeding the replaced classifier[4] 1x1 conv

LANE_TILE = 2048            # kernel-1 flattened-HW tile and kernel-2 W tile (multiple of 128)
ROW_TILE = 256              # kernel-2 output-row tile (multiple of 8)
VMEM_LIMIT = 48 * 1024 * 1024


def _round_up(n: int, m: int) -> int:
    return ((n + m - 1) // m) * m


# ---------------------------------------------------------------------------
# Gaussian helpers (same math as the PyTorch `gaussian` helper).
# ---------------------------------------------------------------------------
def gaussian_1d_np(window_size: int, sigma: float) -> np.ndarray:
    x = np.arange(window_size, dtype=np.float64) - window_size // 2
    g = np.exp(-(x ** 2) / (2.0 * sigma ** 2))
    g = g / g.sum()
    return g.astype(np.float32)


def gaussian_2d(window_size: int, sigma: float) -> jnp.ndarray:
    g = jnp.asarray(gaussian_1d_np(window_size, sigma))
    return g[:, None] * g[None, :]


# ---------------------------------------------------------------------------
# Precomputed per-axis operators (built band-wise in NumPy, cached per shape).
# ---------------------------------------------------------------------------
def _bilinear_matrix_np(n_out: int, n_in: int) -> np.ndarray:
    """(n_out, n_in) operator matching F.interpolate(mode='bilinear', align_corners=False):
    half-pixel centers + edge clamping (torchvision FCN upsample)."""
    scale = n_in / n_out
    dst = np.arange(n_out, dtype=np.float64)
    src = np.maximum((dst + 0.5) * scale - 0.5, 0.0)
    i0 = np.floor(src).astype(np.int64)
    lam = (src - i0).astype(np.float32)
    i0 = np.clip(i0, 0, n_in - 1)
    i1 = np.clip(i0 + 1, 0, n_in - 1)
    a = np.zeros((n_out, n_in), np.float32)
    rows = np.arange(n_out)
    np.add.at(a, (rows, i0), 1.0 - lam)
    np.add.at(a, (rows, i1), lam)
    return a


def _fused_axis_operator_np(n_out: int, n_in: int, n_out_pad: int,
                            kernel_size: int, sigma: float) -> np.ndarray:
    """(n_out_pad, n_in) operator: zero-padded 'same' 1-D gaussian cross-correlation (what
    nn.Conv2d(padding='same', padding_mode='zeros') does along one axis) folded into the
    bilinear upsample.  Rows >= n_out are zero padding (lane-dense store pad)."""
    taps = gaussian_1d_np(kernel_size, sigma)
    a = _bilinear_matrix_np(n_out, n_in)
    half = kernel_size // 2
    b = np.zeros((n_out_pad, n_in), np.float32)
    for t in range(kernel_size):
        off = t - half
        lo = max(0, -off)
        hi = min(n_out, n_out - off)
        if hi > lo:
            b[lo:hi] += taps[t] * a[lo + off:hi + off]
    return b


@functools.lru_cache(maxsize=None)
def _fused_operators(h: int, w: int, hf: int, wf: int, w_pad: int,
                     kernel_size: int, sigma: float):
    bh = jnp.asarray(_fused_axis_operator_np(h, hf, h, kernel_size, sigma))               # (H, Hf)
    bwt = jnp.asarray(_fused_axis_operator_np(w, wf, w_pad, kernel_size, sigma).T.copy())  # (Wf, W_pad)
    return bh, bwt


# ---------------------------------------------------------------------------
# Pallas kernel 1: replaced classifier[4] — Conv2d(C_FEAT, 1, 1x1).
# A 1x1 conv over channels is a matmul: out[hw] = w(1,C) @ f(C, HW_tile) + bias.
# HBM-bound on the 512-channel feature read; flattened HW tiled in 2048-lane blocks.
# ---------------------------------------------------------------------------
def _classifier_1x1_kernel(b_ref, w_ref, f_ref, o_ref):
    w = w_ref[...].astype(f_ref.dtype)
    acc = jnp.dot(w, f_ref[0], preferred_element_type=jnp.float32)   # (1, TN) f32 accumulate
    o_ref[0] = (acc + b_ref[0]).astype(o_ref.dtype)


def classifier_1x1(features, weight, bias):
    """(B, C, Hf, Wf) -> (B, 1, Hf, Wf)."""
    b, c, hf, wf = features.shape
    hw = hf * wf
    f2 = features.reshape(b, c, hw)                  # contiguous flatten, no HBM copy
    tn = hw if hw <= LANE_TILE else LANE_TILE        # full extent when small, else 2048 lanes
    grid = (b, pl.cdiv(hw, tn))
    out = pl.pallas_call(
        _classifier_1x1_kernel,
        out_shape=jax.ShapeDtypeStruct((b, 1, hw), jnp.float32),
        grid=grid,
        in_specs=[
            pl.BlockSpec(memory_space=pltpu.MemorySpace.SMEM),       # bias (1,)
            pl.BlockSpec((1, c), lambda bi, t: (0, 0)),              # weight (1, C)
            pl.BlockSpec((1, c, tn), lambda bi, t: (bi, 0, t)),      # feature tile
        ],
        out_specs=pl.BlockSpec((1, 1, tn), lambda bi, t: (bi, 0, t)),
        compiler_params=pltpu.CompilerParams(
            dimension_semantics=("parallel", "parallel"),
            vmem_limit_bytes=VMEM_LIMIT),
    )(bias, weight, f2)
    return out.reshape(b, 1, hf, wf)


# ---------------------------------------------------------------------------
# Pallas kernel 2 (fused): bilinear upsample (align_corners=False) + 5x5 'same'
# Gaussian smoothing, as  out = B_h @ raw @ B_w^T  with precomputed operators.
# Grid: (batch, output-row tiles, output-col tiles); two small MXU matmuls per step.
# ---------------------------------------------------------------------------
def _upsample_smooth_kernel(raw_ref, bh_ref, bwt_ref, o_ref):
    low = raw_ref[0].astype(jnp.float32)                                   # (Hf, Wf)
    t = jnp.dot(bh_ref[...], low, preferred_element_type=jnp.float32)      # (TH, Wf)
    o_ref[0] = jnp.dot(t, bwt_ref[...],
                       preferred_element_type=jnp.float32).astype(o_ref.dtype)   # (TH, TW)


def upsample_and_smooth(raw, out_hw):
    """(B, 1, Hf, Wf) -> (B, 1, H, W)."""
    b, _, hf, wf = raw.shape
    h, w = out_hw
    w_pad = _round_up(w, 128)                        # lane-dense stores regardless of W
    bh, bwt = _fused_operators(h, w, hf, wf, w_pad, KERNEL_SIZE, float(SIGMA))
    raw3 = raw.reshape(b, hf, wf)
    th = h if h <= ROW_TILE else ROW_TILE
    tw = w_pad if w_pad <= LANE_TILE else LANE_TILE
    grid = (b, pl.cdiv(h, th), pl.cdiv(w_pad, tw))
    out = pl.pallas_call(
        _upsample_smooth_kernel,
        out_shape=jax.ShapeDtypeStruct((b, h, w_pad), jnp.float32),
        grid=grid,
        in_specs=[
            pl.BlockSpec((1, hf, wf), lambda bi, r, c: (bi, 0, 0)),   # low-res logits (tiny)
            pl.BlockSpec((th, hf), lambda bi, r, c: (r, 0)),          # fused row-operator tile
            pl.BlockSpec((wf, tw), lambda bi, r, c: (0, c)),          # fused col-operator tile
        ],
        out_specs=pl.BlockSpec((1, th, tw), lambda bi, r, c: (bi, r, c)),
        compiler_params=pltpu.CompilerParams(
            dimension_semantics=("parallel", "parallel", "parallel"),
            vmem_limit_bytes=VMEM_LIMIT),
    )(raw3, bh, bwt)
    if w_pad != w:
        out = out[:, :, :w]
    return out.reshape(b, 1, h, w)


# ---------------------------------------------------------------------------
# Full forward (eval mode; the module's self.dropout / center_bias are unused in forward).
# ---------------------------------------------------------------------------
def eye_fixation_forward(fcn_features, image_hw, params):
    # TODO(synk): frozen COCO-pretrained FCN-ResNet101 backbone + classifier[:4] cannot be
    # re-created in-script; `fcn_features` stands in for their 512-channel, stride-8 output.
    raw = classifier_1x1(fcn_features, params["cls_w"], params["cls_b"])   # (B, 1, Hf, Wf)
    return upsample_and_smooth(raw, image_hw)                              # (B, 1, H, W)


if __name__ == "__main__":
    key = jax.random.PRNGKey(0)
    kx, kf, kw, kb = jax.random.split(key, 4)

    B, H, W = 2, 32, 32
    Hf, Wf = H // 8, W // 8                   # FCN-ResNet101 output stride is 8

    # NCHW image (consumed only by the untranslated pretrained backbone).
    x = jax.random.normal(kx, (B, 3, H, W), dtype=jnp.float32)
    # Deterministic stand-in for classifier[:4](backbone(x)['out']): (B, 512, H/8, W/8).
    fcn_features = jax.random.normal(kf, (B, C_FEAT, Hf, Wf), dtype=jnp.float32)

    # Deterministic init of the replaced classifier[4] = Conv2d(512, 1, 1x1) (PyTorch uniform bound).
    bound = float(1.0 / np.sqrt(C_FEAT))
    params = {
        "cls_w": jax.random.uniform(kw, (1, C_FEAT), jnp.float32, -bound, bound),
        "cls_b": jax.random.uniform(kb, (1,), jnp.float32, -bound, bound),
        "gauss_2d": gaussian_2d(KERNEL_SIZE, SIGMA),   # parity with the module's non-trainable self.kernel
    }

    out = eye_fixation_forward(fcn_features, (H, W), params)
    out = jax.block_until_ready(out)
    assert out.shape == (B, 1, H, W) and out.dtype == jnp.float32
    print("KERNEL_OK")
</pallas_src>

<mosaic_0001>
module attributes {stable_mosaic.version = 11 : i64} {
  func.func @_classifier_1x1_kernel(%arg0: i32, %arg1: i32, %arg2: memref<1xf32, #tpu.memory_space<smem>>, %arg3: memref<1x512xf32, #tpu.memory_space<vmem>>, %arg4: memref<1x512x16xf32, #tpu.memory_space<vmem>>, %arg5: memref<1x1x16xf32, #tpu.memory_space<vmem>>) attributes {dimension_semantics = [#tpu.dimension_semantics<parallel>, #tpu.dimension_semantics<parallel>], iteration_bounds = array<i64: 2, 1>, scalar_prefetch = 0 : i64, scratch_operands = 0 : i64, tpu.core_type = #tpu.core_type<tc>, window_params = [{transform_indices = @transform_0, window_bounds = array<i64: 1>}, {pipeline_mode = #tpu.pipeline_mode<synchronous>, transform_indices = @transform_1, window_bounds = array<i64: 1, 512>}, {transform_indices = @transform_2, window_bounds = array<i64: 1, 512, 16>}, {transform_indices = @transform_3, window_bounds = array<i64: 1, 1, 16>}]} {
    %c0 = arith.constant 0 : index
    %c0_0 = arith.constant 0 : index
    %0 = vector.load %arg3[%c0, %c0_0] : memref<1x512xf32, #tpu.memory_space<vmem>>, vector<1x512xf32>
    %c0_1 = arith.constant 0 : index
    %c0_2 = arith.constant 0 : index
    %c0_3 = arith.constant 0 : index
    %1 = vector.load %arg4[%c0_1, %c0_2, %c0_3] : memref<1x512x16xf32, #tpu.memory_space<vmem>>, vector<1x512x16xf32>
    %2 = vector.shape_cast %1 : vector<1x512x16xf32> to vector<512x16xf32>
    %cst = arith.constant dense<0.000000e+00> : vector<1x16xf32>
    %3 = tpu.matmul %0, %2, %cst {dimension_numbers = #tpu.dot_dimension_numbers<[1], [0], [0], [1], [0, 0, 1, 1], [], []>} : vector<1x512xf32>, vector<512x16xf32>, vector<1x16xf32> -> vector<1x16xf32>
    %c0_4 = arith.constant 0 : index
    %4 = memref.load %arg2[%c0_4] : memref<1xf32, #tpu.memory_space<smem>>
    %5 = vector.broadcast %4 : f32 to vector<1x16xf32>
    %6 = arith.addf %3, %5 : vector<1x16xf32>
    %c0_5 = arith.constant 0 : index
    %c0_6 = arith.constant 0 : index
    %c0_7 = arith.constant 0 : index
    %7 = vector.load %arg5[%c0_5, %c0_6, %c0_7] : memref<1x1x16xf32, #tpu.memory_space<vmem>>, vector<1x1x16xf32>
    %8 = vector.shape_cast %7 : vector<1x1x16xf32> to vector<1x16xf32>
    %9 = vector.shape_cast %6 : vector<1x16xf32> to vector<1x1x16xf32>
    tpu.vector_store %arg5[%c0_5, %c0_6, %c0_7], %9 {strides = array<i32>} : memref<1x1x16xf32, #tpu.memory_space<vmem>>, vector<1x1x16xf32>,
    return
  }
  func.func @transform_0(%arg0: i32, %arg1: i32) -> i32 {
    %c0_i32 = arith.constant 0 : i32
    %c0_i32_0 = arith.constant 0 : i32
    return %c0_i32 : i32
  }
  func.func @transform_1(%arg0: i32, %arg1: i32) -> (i32, i32) {
    %c0_i32 = arith.constant 0 : i32
    %c0_i32_0 = arith.constant 0 : i32
    %c0_i32_1 = arith.constant 0 : i32
    return %c0_i32, %c0_i32_0 : i32, i32
  }
  func.func @transform_2(%arg0: i32, %arg1: i32) -> (i32, i32, i32) {
    %c0_i32 = arith.constant 0 : i32
    %c0_i32_0 = arith.constant 0 : i32
    return %arg0, %c0_i32, %arg1 : i32, i32, i32
  }
  func.func @transform_3(%arg0: i32, %arg1: i32) -> (i32, i32, i32) {
    %c0_i32 = arith.constant 0 : i32
    %c0_i32_0 = arith.constant 0 : i32
    return %arg0, %c0_i32, %arg1 : i32, i32, i32
  }
}

</mosaic_0001>

<bundles_post_ra>
// kernel: tpu_custom_call.1
= control target key start
LH: loop header
LB: loop body
LE: loop exit
PB: predicated region body
PF: predicated region fallthrough
CT: control target
= control target key end

     0   :  { %s770_s0 = inlined_call_operand.<no memory space> [shape: f32[1], index: 0, kind: input, shape index: {}]   ;;  %s771_s1 = inlined_call_operand.vmem [shape: f32[1,512], index: 1, kind: input, shape index: {}]   ;;  %s772_s2 = inlined_call_operand.vmem [shape: f32[2,512,16], index: 2, kind: input, shape index: {}]   ;;  %s773_s3 = inlined_call_operand.hbm [shape: f32[2,1,16], index: 3, kind: output, shape index: {}]  }
   0x1   :  { %8 = sst [smem:[#allocation2]] %s770_s0 }
   0x2   :  { %9 = vsyncpa [#allocation4], 0 }
   0x3   :  { %11 = vsyncpa [#allocation4 + $0x1], 0  ;;  %s604_s14 = smov 0   ;;  %s606_s15 = smov 0  }
   0x4   :  { %s608_s16 = smov 0   ;;  %s610_s17 = smov 0  }
   0x5   :  { %s612_s18 = smov 0   ;;  %s614_s19 = smov 0  }
   0x6 LB: > { %s436_s0 = sadd.s32 4294967295, %s579_s19   ;;  %s437_s20 = sadd.s32 4294967294, %s579_s19   ;;  %s579_s19 = sphi %s614_s19, %s17_s19   ;;  %s575_s18 = sphi %s612_s18, %s780_s18   ;;  %s571_s17 = sphi %s610_s17, %s779_s17   ;;  %s567_s16 = sphi %s608_s16, %s778_s16   ;;  %s563_s15 = sphi %s606_s15, %s777_s15   ;;  %s559_s14 = sphi %s604_s14, %s776_s14  }
   0x7   : > { %s29_s21 = sadd.s32 1, %s575_s18  ;;  %s108_s22 = sadd.s32 1, %s567_s16 }
   0x8   : > { %p31_p0 = scmp.ge.s32.totalorder %s29_s21, 2  ;;  %p118_p1 = scmp.ne.s32.totalorder %s567_s16, %s563_s15 }
   0x9   : > { %p119_p2 = scmp.eq.s32.totalorder %s436_s0, 1  ;;  %p124_p3 = scmp.ne.s32.totalorder %s563_s15, %s559_s14 }
   0xa   : > { %s782_s21 = smov (%p31_p0, %s29_s21), 0  ;;  %p125_p5 = scmp.eq.s32.totalorder %s437_s20, 1 }
   0xb   : > { %p644_p4 = por %p119_p2, %p118_p1  ;;  %s103_s24 = ssub.s32 %s575_s18, %s782_s21 }
   0xc   : > { %p440_p6 = scmp.ge.s32.totalorder %s579_s19, 1  ;;  %p106_p7 = scmp.eq.s32.totalorder %s103_s24, 0 }
   0xd   : > { %p651_p8 = por %p125_p5, %p124_p3  ;;  %p160_p9 = scmp.lt.s32.totalorder %s579_s19, 3 }
   0xe   : > { %s657_s26 = scalar_select %p106_p7, %s567_s16, %s108_s22  }
   0xf   : > { %p161_p10 = pnand %p440_p6, %p160_p9 }
  0x10   : > { %p186_p11 = scmp.lt.s32.totalorder (!%p161_p10), %s571_s17, 1  ;;  %s259_s7 = sld [smem:[#allocation2]] (!%p161_p10) }
  0x11   : > { %164 = sbr.rel (%p161_p10) target bundleno = 198 (0xc6), region = 32  ;;  %s184_s8 = sand.u32 (!%p161_p10), 1, %s563_s15  }
  0x12   : > { %s362_s11 = scalar_lea.hbm (!%p161_p10), %s773_s3, %s571_s17  ;;  %s185_s12 = scalar_lea.vmem (!%p161_p10), [#allocation3], %s184_s8 }
  0x13   : > { %s364_s13 = sshll.u32 (!%p161_p10), %s185_s12, 4  ;;  %s366_s0 = sshll.u32 (!%p161_p10), %s362_s11, 4  ;;  %s365_s13 = int_to_ptr.vmem [resolvable:$true] %s364_s13  ;;  %s367_s0 = int_to_ptr.hbm [resolvable:$true] %s366_s0 }
  0x14   : > { %s353_s20 = scalar_lea.sflag (!%p161_p10), [#allocation4], %s184_s8  ;;  %s515_s22 = sshra.s32 (!%p161_p10), %s367_s0, 4  ;;  %s516_s22 = int_to_ptr.hbm [resolvable:$true] %s515_s22 }
  0x15   : > { %s517_s24 = scalar_lea.hbm (!%p161_p10), %s516_s22, 1  ;;  %p522_p1 = scmp.lt.s32.totalorder (!%p161_p10), %s516_s22, %s773_s3 }
  0x16   : > { %s187_s27 = scalar_select %p186_p11, %s571_s17, 1  ;;  %v194_v56 = vld [vmem:[%s771_s1] sm:$0xf]  ;;  %vm350_vm0 = vcmask 122880  }
  0x17   : > { %v264_v62 = vperm.slane %v194_v56, 2  ;;  %p518_p12 = scmp.ne.s32.totalorder %s516_s22, %s517_s24 }
  0x18   : > { %s445_s28 = sshll.u32 %s187_s27, 9 }
  0x19   : > { %s664_s4 = scalar_lea.vmem %s772_s2, %s445_s28  ;;  %p519_p13 = pnand %p518_p12, %p644_p4 }
  0x1a   : > { %v242_v0 = vld [vmem:[%s664_s4 + $0x178] sm:$0xff]  ;;  %v241_v2 = vld [vmem:[%s664_s4 + $0x170] sm:$0xff]  ;;  %v240_v6 = vld [vmem:[%s664_s4 + $0x168] sm:$0xff]  ;;  %s521_s28 = scalar_lea.hbm %s773_s3, 2 }
  0x1b   : > { %v210_v1 = vld [vmem:[%s664_s4 + $0x78] sm:$0xff]  ;;  %310 = vmatpush.msra.mxu2 %v242_v0  ;;  %v209_v4 = vld [vmem:[%s664_s4 + $0x70] sm:$0xff]  ;;  %v208_v8 = vld [vmem:[%s664_s4 + $0x68] sm:$0xff]  ;;  %p520_p0 = pneg %p519_p13  ;;  %p523_p2 = scmp.lt.s32.totalorder %s521_s28, %s517_s24 }
  0x1c   : > { %270 = vmatpush.msra.mxu0 %v210_v1  ;;  %v258_v3 = vld [vmem:[%s664_s4 + $0x1f8] sm:$0xff]  ;;  %v257_v7 = vld [vmem:[%s664_s4 + $0x1f0] sm:$0xff]  ;;  %v256_v10 = vld [vmem:[%s664_s4 + $0x1e8] sm:$0xff]  ;;  %v262_v1 = vperm.slane %v194_v56, 0 }
  0x1d   : > { %v226_v5 = vld [vmem:[%s664_s4 + $0xf8] sm:$0xff]  ;;  %330 = vmatpush.msra.mxu3 %v258_v3  ;;  %311 = vmatpush.msra.mxu2 %v241_v2  ;;  %v225_v9 = vld [vmem:[%s664_s4 + $0xf0] sm:$0xff]  ;;  %v239_v11 = vld [vmem:[%s664_s4 + $0x160] sm:$0xff]  ;;  %v265_v2 = vperm.slane %v194_v56, 3  ;;  %p524_p3 = por %p523_p2, %p522_p1 }
  0x1e   : > { %290 = vmatpush.msra.mxu1 %v226_v5  ;;  %271 = vmatpush.msra.mxu0 %v209_v4  ;;  %v207_v12 = vld [vmem:[%s664_s4 + $0x60] sm:$0xff]  ;;  %v224_v13 = vld [vmem:[%s664_s4 + $0xe8] sm:$0xff]  ;;  %v238_v16 = vld [vmem:[%s664_s4 + $0x158] sm:$0xff]  ;;  %v263_v4 = vperm.slane %v194_v56, 1  ;;  %v260_v5 = vstv %s259_s7 }
  0x1f   : > { %331 = vmatpush.msra.mxu3 %v257_v7  ;;  %312 = vmatpush.msra.mxu2 %v240_v6  ;;  %v255_v14 = vld [vmem:[%s664_s4 + $0x1e0] sm:$0xff]  ;;  %v206_v17 = vld [vmem:[%s664_s4 + $0x58] sm:$0xff]  ;;  %v237_v20 = vld [vmem:[%s664_s4 + $0x150] sm:$0xff]  ;;  %p525_p5 = pnand %p524_p3, %p520_p0 }
  0x20   : > { %291 = vmatpush.msra.mxu1 %v225_v9  ;;  %272 = vmatpush.msra.mxu0 %v208_v8  ;;  %v223_v15 = vld [vmem:[%s664_s4 + $0xe0] sm:$0xff]  ;;  %v254_v18 = vld [vmem:[%s664_s4 + $0x1d8] sm:$0xff]  ;;  %v205_v21 = vld [vmem:[%s664_s4 + $0x50] sm:$0xff] }
  0x21   : > { %332 = vmatpush.msra.mxu3 %v256_v10  ;;  %313 = vmatpush.msra.mxu2 %v239_v11  ;;  %v222_v19 = vld [vmem:[%s664_s4 + $0xd8] sm:$0xff]  ;;  %v253_v22 = vld [vmem:[%s664_s4 + $0x1d0] sm:$0xff]  ;;  %v236_v24 = vld [vmem:[%s664_s4 + $0x148] sm:$0xff] }
  0x22   : > { %292 = vmatpush.msra.mxu1 %v224_v13  ;;  %273 = vmatpush.msra.mxu0 %v207_v12  ;;  %v221_v23 = vld [vmem:[%s664_s4 + $0xd0] sm:$0xff]  ;;  %v204_v25 = vld [vmem:[%s664_s4 + $0x48] sm:$0xff]  ;;  %v235_v28 = vld [vmem:[%s664_s4 + $0x140] sm:$0xff] }
  0x23   : > { %333 = vmatpush.msra.mxu3 %v255_v14  ;;  %314 = vmatpush.msra.mxu2 %v238_v16  ;;  %v252_v26 = vld [vmem:[%s664_s4 + $0x1c8] sm:$0xff]  ;;  %v203_v29 = vld [vmem:[%s664_s4 + $0x40] sm:$0xff]  ;;  %v234_v32 = vld [vmem:[%s664_s4 + $0x138] sm:$0xff] }
  0x24   : > { %293 = vmatpush.msra.mxu1 %v223_v15  ;;  %274 = vmatpush.msra.mxu0 %v206_v17  ;;  %v220_v27 = vld [vmem:[%s664_s4 + $0xc8] sm:$0xff]  ;;  %v251_v30 = vld [vmem:[%s664_s4 + $0x1c0] sm:$0xff]  ;;  %v202_v33 = vld [vmem:[%s664_s4 + $0x38] sm:$0xff] }
  0x25   : > { %334 = vmatpush.msra.mxu3 %v254_v18  ;;  %315 = vmatpush.msra.mxu2 %v237_v20  ;;  %v219_v31 = vld [vmem:[%s664_s4 + $0xc0] sm:$0xff]  ;;  %v250_v34 = vld [vmem:[%s664_s4 + $0x1b8] sm:$0xff]  ;;  %v233_v36 = vld [vmem:[%s664_s4 + $0x130] sm:$0xff] }
  0x26   : > { %294 = vmatpush.msra.mxu1 %v222_v19  ;;  %275 = vmatpush.msra.mxu0 %v205_v21  ;;  %v218_v35 = vld [vmem:[%s664_s4 + $0xb8] sm:$0xff]  ;;  %v201_v37 = vld [vmem:[%s664_s4 + $0x30] sm:$0xff]  ;;  %v232_v40 = vld [vmem:[%s664_s4 + $0x128] sm:$0xff] }
  0x27   : > { %335 = vmatpush.msra.mxu3 %v253_v22  ;;  %316 = vmatpush.msra.mxu2 %v236_v24  ;;  %v249_v38 = vld [vmem:[%s664_s4 + $0x1b0] sm:$0xff]  ;;  %v200_v41 = vld [vmem:[%s664_s4 + $0x28] sm:$0xff]  ;;  %v231_v44 = vld [vmem:[%s664_s4 + $0x120] sm:$0xff] }
  0x28   : > { %295 = vmatpush.msra.mxu1 %v221_v23  ;;  %276 = vmatpush.msra.mxu0 %v204_v25  ;;  %v217_v39 = vld [vmem:[%s664_s4 + $0xb0] sm:$0xff]  ;;  %v248_v42 = vld [vmem:[%s664_s4 + $0x1a8] sm:$0xff]  ;;  %v199_v45 = vld [vmem:[%s664_s4 + $0x20] sm:$0xff] }
  0x29   : > { %336 = vmatpush.msra.mxu3 %v252_v26  ;;  %317 = vmatpush.msra.mxu2 %v235_v28  ;;  %v216_v43 = vld [vmem:[%s664_s4 + $0xa8] sm:$0xff]  ;;  %v247_v46 = vld [vmem:[%s664_s4 + $0x1a0] sm:$0xff]  ;;  %v230_v48 = vld [vmem:[%s664_s4 + $0x118] sm:$0xff] }
  0x2a   : > { %296 = vmatpush.msra.mxu1 %v220_v27  ;;  %277 = vmatpush.msra.mxu0 %v203_v29  ;;  %v215_v47 = vld [vmem:[%s664_s4 + $0xa0] sm:$0xff]  ;;  %v198_v49 = vld [vmem:[%s664_s4 + $0x18] sm:$0xff]  ;;  %v229_v52 = vld [vmem:[%s664_s4 + $0x110] sm:$0xff] }
  0x2b   : > { %337 = vmatpush.msra.mxu3 %v251_v30  ;;  %318 = vmatpush.msra.mxu2 %v234_v32  ;;  %v246_v50 = vld [vmem:[%s664_s4 + $0x198] sm:$0xff]  ;;  %v197_v53 = vld [vmem:[%s664_s4 + $0x10] sm:$0xff]  ;;  %v228_v57 = vld [vmem:[%s664_s4 + $0x108] sm:$0xff] }
  0x2c   : > { %297 = vmatpush.msra.mxu1 %v219_v31  ;;  %278 = vmatpush.msra.mxu0 %v202_v33  ;;  %v214_v51 = vld [vmem:[%s664_s4 + $0x98] sm:$0xff]  ;;  %v245_v54 = vld [vmem:[%s664_s4 + $0x190] sm:$0xff]  ;;  %v196_v58 = vld [vmem:[%s664_s4 + $0x8] sm:$0xff] }
  0x2d   : > { %338 = vmatpush.msra.mxu3 %v250_v34  ;;  %319 = vmatpush.msra.mxu2 %v233_v36  ;;  %v213_v55 = vld [vmem:[%s664_s4 + $0x90] sm:$0xff]  ;;  %v244_v59 = vld [vmem:[%s664_s4 + $0x188] sm:$0xff]  ;;  %v227_v61 = vld [vmem:[%s664_s4 + $0x100] sm:$0xff] }
  0x2e   : > { %298 = vmatpush.msra.mxu1 %v218_v35  ;;  %279 = vmatpush.msra.mxu0 %v201_v37  ;;  %v212_v60 = vld [vmem:[%s664_s4 + $0x88] sm:$0xff]  ;;  %v195_v63 = vld [vmem:[%s664_s4] sm:$0xff] }
  0x2f   : > { %339 = vmatpush.msra.mxu3 %v249_v38  ;;  %320 = vmatpush.msra.mxu2 %v232_v40  ;;  %v243_v0 = vld [vmem:[%s664_s4 + $0x180] sm:$0xff] }
  0x30   : > { %299 = vmatpush.msra.mxu1 %v217_v39  ;;  %280 = vmatpush.msra.mxu0 %v200_v41  ;;  %v211_v3 = vld [vmem:[%s664_s4 + $0x80] sm:$0xff] }
  0x31   : > { %340 = vmatpush.msra.mxu3 %v248_v42  ;;  %321 = vmatpush.msra.mxu2 %v231_v44 }
  0x32   : > { %300 = vmatpush.msra.mxu1 %v216_v43  ;;  %281 = vmatpush.msra.mxu0 %v199_v45 }
  0x33   : > { %341 = vmatpush.msra.mxu3 %v247_v46  ;;  %322 = vmatpush.msra.mxu2 %v230_v48 }
  0x34   : > { %301 = vmatpush.msra.mxu1 %v215_v47  ;;  %282 = vmatpush.msra.mxu0 %v198_v49 }
  0x35   : > { %342 = vmatpush.msra.mxu3 %v246_v50  ;;  %323 = vmatpush.msra.mxu2 %v229_v52 }
  0x36   : > { %302 = vmatpush.msra.mxu1 %v214_v51  ;;  %283 = vmatpush.msra.mxu0 %v197_v53 }
  0x37   : > { %343 = vmatpush.msra.mxu3 %v245_v54  ;;  %324 = vmatpush.msra.mxu2 %v228_v57 }
  0x38   : > { %303 = vmatpush.msra.mxu1 %v213_v55  ;;  %284 = vmatpush.msra.mxu0 %v196_v58 }
  0x39   : > { %344 = vmatpush.msra.mxu3 %v244_v59  ;;  %325 = vmatpush.msra.mxu2 %v227_v61 }
  0x3a   : > { %304 = vmatpush.msra.mxu1 %v212_v60  ;;  %285 = vmatpush.msra.mxu0 %v195_v63 }
  0x3b   : > { %326 = vmatmul.f32.vlgmr.msra.gmra.mxu2 %v264_v62  ;;  %345 = vmatpush.msra.mxu3 %v243_v0 }
  0x3c   : > { %286 = vmatmul.f32.vlgmr.msra.gmra.mxu0 %v262_v1  ;;  %346 = vmatmul.f32.vlgmr.msra.gmra.mxu3 %v265_v2 }
  0x3d   : > { %305 = vmatpush.msra.mxu1 %v211_v3 }
  0x3e   : > { %306 = vmatmul.f32.vlgmr.msra.gmra.mxu1 %v263_v4 }
  0xb9   : > { %v287_v6 = vpop.f32.mrf.mxu0 }
  0xba   : > { %v288_v7 = vadd.f32 %v287_v6, %v260_v5 }
  0xbb   : > { %v307_v8 = vpop.f32.mrf.mxu1 }
  0xbc   : > { %v308_v9 = vadd.f32 %v307_v8, %v288_v7 }
  0xbe   : > { %v327_v10 = vpop.f32.mrf.mxu2 }
  0xbf   : > { %v328_v11 = vadd.f32 %v327_v10, %v308_v9  ;;  %v347_v12 = vpop.f32.mrf.mxu3 }
  0xc1   : > { %v348_v13 = vadd.f32 %v347_v12, %v328_v11 }
  0xc3   : > { %351 = vst.msk [vmem:[%s185_s12] sm:$0x1] %vm350_vm0, %v348_v13 }
  0xc4   : > { %528 = shalt.err (!%p525_p5)
}
  0xc5   : > { %446 = dma.vmem_to_hbm [thread:$0]  (%p644_p4), %s365_s13, 16, %s367_s0, %s353_s20  }
  0xc6 PF: > { %p452_p6 = scmp.ge.s32.totalorder %s579_s19, 2  ;;  %s378_s4 = sand.u32 1, %s559_s14  }
  0xc7   : > { %s379_s5 = scalar_lea.sflag [#allocation4], %s378_s4 }
  0xc8   : > { %p449_p7 = pnand %p452_p6, %p651_p8 }
  0xca   : > { %p450_p9 = pneg %p449_p7 }
  0xcc   : > { %554 = dma.done.wait (%p450_p9), %s379_s5, 16  }
  0xcd   : > { %556 = vsyncadd (%p450_p9), %s379_s5, 4294967280  ;;  %s17_s19 = sadd.s32 1, %s579_s19   ;;  %s776_s14 = smov %s563_s15 }
  0xce   : > { %p14_p10 = scmp.ge.s32.totalorder %s17_s19, 4   ;;  %s777_s15 = smov %s567_s16 }
  0xcf   : > { %s778_s16 = smov %s657_s26  ;;  %s779_s17 = smov %s575_s18 }
  0xd0   : > { %s780_s18 = smov %s782_s21  ;;  %16 = sbr.rel (!%p14_p10) target bundleno = 6 (0x6), region = 67 }
  0xd5   :  { %384 = vsyncpa [#allocation4], 1 }
  0xd6   :  { %386 = vsyncpa [#allocation4 + $0x1], 1 }

</bundles_post_ra>
